<compile_context>
chip_gen: v7x
topology: tpu7x:2x2x1
jax: 0.10.0
libtpu: 0.0.40
codegen_flags: <defaults>
</compile_context>

<pallas_src>
import math
import functools

import jax
import jax.numpy as jnp
from jax.experimental import pallas as pl
from jax.experimental.pallas import tpu as pltpu


def _round_up(x, mult):
    return ((x + mult - 1) // mult) * mult


def _shrink(v, mult):
    return max(mult, _round_up(v // 2, mult))


def _amsoftmax_kernel(x_ref, wt_ref, lb_ref, out_ref, *, s, m, tn, tc, x_resident):
    # x_ref:   (TN, D) or (N_pad, D) pre-normalized x tile, mm_dtype
    # wt_ref:  (D, TC)  pre-normalized, pre-transposed weight tile (resident over N)
    # lb_ref:  (TN, 1)  int32 labels for this N tile
    # out_ref: (TN, TC) output tile
    ci = pl.program_id(0)

    if x_resident:
        ni = pl.program_id(1)
        row0 = pl.multiple_of(ni * tn, tn)
        xn = x_ref[pl.ds(row0, tn), :]
    else:
        xn = x_ref[...]

    # (TN, D) @ (D, TC) on the MXU, f32 accumulation, no transposes.
    costh = jax.lax.dot_general(
        xn, wt_ref[...],
        dimension_numbers=(((1,), (0,)), ((), ())),
        preferred_element_type=jnp.float32)

    # Fused margin + scale epilogue: shift the (TN,1) label into tile-local
    # coordinates instead of adding ci*TC to the full (TN,TC) iota.
    lb_local = lb_ref[...] - ci * tc                       # (TN, 1)
    cls_idx = jax.lax.broadcasted_iota(jnp.int32, costh.shape, 1)
    scaled = jnp.float32(s) * costh
    out_ref[...] = jnp.where(cls_idx == lb_local,
                             scaled - jnp.float32(s * m),
                             scaled).astype(out_ref.dtype)


_X_RESIDENT_MAX_BYTES = 4 * 1024 * 1024   # keep resident-x buffer small


def amsoftmax_forward(x, weight, lb, *, s=30.0, m=0.3,
                      tn=512, tc=1024,
                      mm_dtype=jnp.bfloat16,
                      out_dtype=jnp.float32,
                      x_resident=None):
    """x: (N, D), weight: (C, D), lb: (N,) int in [0, C) -> (N, C) out_dtype."""
    N, D = x.shape
    C, D2 = weight.shape
    assert D == D2
    assert lb.shape[0] == N

    mm_bytes = jnp.dtype(mm_dtype).itemsize
    out_bytes = jnp.dtype(out_dtype).itemsize

    # --- Hoisted: normalize both operands ONCE, outside the grid (XLA). ---
    # max(sumsq, 1e-24) + rsqrt matches torch's norm.clamp(min=1e-12).
    w32 = weight.astype(jnp.float32)
    w_inv = jax.lax.rsqrt(
        jnp.maximum(jnp.sum(w32 * w32, axis=1, keepdims=True), jnp.float32(1e-24)))
    wt = (w32 * w_inv).T.astype(mm_dtype)            # (D, C), lane-dense in C

    x32 = x.astype(jnp.float32)
    x_inv = jax.lax.rsqrt(
        jnp.maximum(jnp.sum(x32 * x32, axis=1, keepdims=True), jnp.float32(1e-24)))
    xn = (x32 * x_inv).astype(mm_dtype)              # (N, D)

    # --- Tile sizing under a computed VMEM budget. ---
    TN = min(tn, _round_up(N, 8))
    TC = min(tc, _round_up(C, 128))

    if x_resident is None:
        x_resident = _round_up(N, TN) * D * mm_bytes <= _X_RESIDENT_MAX_BYTES

    try:
        vmem_cap = pltpu.get_tpu_info().vmem_capacity_bytes
    except Exception:
        vmem_cap = 64 * 1024 * 1024                   # v7x-safe fallback
    hard_cap = int(vmem_cap * 0.85)
    budget = min(int(vmem_cap * 0.6), 100 * 1024 * 1024)

    def fp(tn_, tc_):
        n_pad_ = _round_up(N, tn_)
        f = 2 * D * tc_ * mm_bytes                    # weight tile (double-buffered)
        f += 2 * tn_ * tc_ * out_bytes                # output tile
        f += 2 * tn_ * 128 * 4                        # label tile (lane-padded)
        f += 2 * (n_pad_ if x_resident else tn_) * D * mm_bytes
        return f

    while fp(TN, TC) > budget and (TC > 128 or TN > 8):
        shrink_tc = TC > 128 and (
            TN <= 8 or (D * mm_bytes + TN * out_bytes) * TC
            >= (D * mm_bytes + TC * out_bytes) * TN)
        if shrink_tc:
            TC = _shrink(TC, 128)
        else:
            TN = _shrink(TN, 8)

    N_pad = _round_up(N, TN)
    footprint = fp(TN, TC)
    vmem_limit = int(min(hard_cap, max(2 * footprint, 32 * 1024 * 1024)))

    # Pad only the tiny row operands (x, labels). The weight and the output are
    # left unpadded: Pallas masks edge-block writes on the C / N axes, so we
    # never allocate an (N_pad, C_pad) output or do an out[:N, :C] copy.
    if N_pad != N:
        xn = jnp.pad(xn, ((0, N_pad - N), (0, 0)))
        lb2d = jnp.pad(lb.reshape(N, 1).astype(jnp.int32),
                       ((0, N_pad - N), (0, 0)), constant_values=-1)
    else:
        lb2d = lb.reshape(N, 1).astype(jnp.int32)

    # Grid: C outer, N inner -> the weight block index is constant over the
    # inner axis, so its HBM->VMEM DMA only happens once per C tile.
    grid = (pl.cdiv(C, TC), N_pad // TN)

    if x_resident:
        x_spec = pl.BlockSpec((N_pad, D), lambda ci, ni: (0, 0))   # fetched once
    else:
        x_spec = pl.BlockSpec((TN, D), lambda ci, ni: (ni, 0))

    kernel = functools.partial(_amsoftmax_kernel, s=float(s), m=float(m),
                               tn=TN, tc=TC, x_resident=bool(x_resident))

    out = pl.pallas_call(
        kernel,
        out_shape=jax.ShapeDtypeStruct((N, C), out_dtype),
        grid=grid,
        in_specs=[
            x_spec,                                               # x (normalized)
            pl.BlockSpec((D, TC), lambda ci, ni: (0, ci)),        # weight (D, C)
            pl.BlockSpec((TN, 1), lambda ci, ni: (ni, 0)),        # labels
        ],
        out_specs=pl.BlockSpec((TN, TC), lambda ci, ni: (ni, ci)),
        compiler_params=pltpu.CompilerParams(
            # C "parallel" / N "arbitrary": a megacore split (v7x) can only land
            # on C, so each TensorCore streams half of the dominant weight bytes.
            dimension_semantics=("parallel", "arbitrary"),
            vmem_limit_bytes=vmem_limit),
    )(xn, wt, lb2d)

    return out


def _reference(x, weight, lb, s=30.0, m=0.3):
    xn = x / jnp.maximum(jnp.linalg.norm(x, axis=1, keepdims=True), 1e-12)
    wn = weight / jnp.maximum(jnp.linalg.norm(weight, axis=1, keepdims=True), 1e-12)
    costh = xn @ wn.T
    delt = jax.nn.one_hot(lb, weight.shape[0], dtype=costh.dtype) * m
    return s * (costh - delt)


if __name__ == "__main__":
    key = jax.random.PRNGKey(0)
    k_x, k_w, k_lb, k_x2, k_w2, k_lb2 = jax.random.split(key, 6)

    s_scale, margin = 30.0, 0.3

    # --- test 1: module-like small shapes; resident-x path. -----------------
    batch, in_features, out_features = 8, 32, 16
    # Deterministic xavier_normal_ init (gain=1): std = sqrt(2/(fan_in+fan_out))
    std = math.sqrt(2.0 / (in_features + out_features))
    weight = std * jax.random.normal(k_w, (out_features, in_features), jnp.float32)
    x = jax.random.normal(k_x, (batch, in_features), jnp.float32)
    lb = jax.random.randint(k_lb, (batch,), 0, out_features, dtype=jnp.int32)

    ref = _reference(x, weight, lb, s=s_scale, m=margin)

    # f32 matmul path: tight tolerance vs the f32 reference.
    out_f32 = jax.block_until_ready(
        amsoftmax_forward(x, weight, lb, s=s_scale, m=margin,
                          mm_dtype=jnp.float32))
    assert out_f32.shape == (batch, out_features)
    assert jnp.allclose(out_f32, ref, atol=1e-4, rtol=1e-4), "f32 mismatch"

    # Default (bf16 operands, f32 accumulation): looser tolerance.
    out_bf = jax.block_until_ready(
        amsoftmax_forward(x, weight, lb, s=s_scale, m=margin))
    assert out_bf.shape == (batch, out_features)
    assert jnp.allclose(out_bf, ref, atol=0.5, rtol=0.05), "bf16 mismatch"

    # --- test 2: non-divisible N/C (edge-block masking) + streamed-x path. --
    N2, D2, C2 = 10, 48, 200
    std2 = math.sqrt(2.0 / (D2 + C2))
    weight2 = std2 * jax.random.normal(k_w2, (C2, D2), jnp.float32)
    x2 = jax.random.normal(k_x2, (N2, D2), jnp.float32)
    lb2 = jax.random.randint(k_lb2, (N2,), 0, C2, dtype=jnp.int32)

    ref2 = _reference(x2, weight2, lb2, s=s_scale, m=margin)
    out2 = jax.block_until_ready(
        amsoftmax_forward(x2, weight2, lb2, s=s_scale, m=margin,
                          mm_dtype=jnp.float32, x_resident=False))
    assert out2.shape == (N2, C2)
    assert jnp.allclose(out2, ref2, atol=1e-4, rtol=1e-4), "edge-block mismatch"

    print("KERNEL_OK")
</pallas_src>

<mosaic_0001>
module attributes {stable_mosaic.version = 11 : i64} {
  func.func @_amsoftmax_kernel(%arg0: i32, %arg1: i32, %arg2: memref<8x32xf32, #tpu.memory_space<vmem>>, %arg3: memref<32x128xf32, #tpu.memory_space<vmem>>, %arg4: memref<8x1xi32, #tpu.memory_space<vmem>>, %arg5: memref<8x128xf32, #tpu.memory_space<vmem>>) attributes {dimension_semantics = [#tpu.dimension_semantics<parallel>, #tpu.dimension_semantics<arbitrary>], iteration_bounds = array<i64: 1, 1>, scalar_prefetch = 0 : i64, scratch_operands = 0 : i64, tpu.core_type = #tpu.core_type<tc>, window_params = [{pipeline_mode = #tpu.pipeline_mode<synchronous>, transform_indices = @transform_0, window_bounds = array<i64: 8, 32>}, {transform_indices = @transform_1, window_bounds = array<i64: 32, 128>}, {transform_indices = @transform_2, window_bounds = array<i64: 8, 1>}, {transform_indices = @transform_3, window_bounds = array<i64: 8, 128>}]} {
    %c8_i32 = arith.constant 8 : i32
    %0 = arith.muli %arg1, %c8_i32 : i32
    %1 = tpu.assume_multiple %0, 8 : i32
    %2 = arith.index_cast %1 : i32 to index
    %c0 = arith.constant 0 : index
    %3 = vector.load %arg2[%2, %c0] : memref<8x32xf32, #tpu.memory_space<vmem>>, vector<8x32xf32>
    %c0_0 = arith.constant 0 : index
    %c0_1 = arith.constant 0 : index
    %4 = vector.load %arg3[%c0_0, %c0_1] : memref<32x128xf32, #tpu.memory_space<vmem>>, vector<32x128xf32>
    %cst = arith.constant dense<0.000000e+00> : vector<8x128xf32>
    %5 = tpu.matmul %3, %4, %cst {dimension_numbers = #tpu.dot_dimension_numbers<[1], [0], [0], [1], [0, 0, 1, 1], [], []>} : vector<8x32xf32>, vector<32x128xf32>, vector<8x128xf32> -> vector<8x128xf32>
    %c0_2 = arith.constant 0 : index
    %c0_3 = arith.constant 0 : index
    %6 = vector.load %arg4[%c0_2, %c0_3] : memref<8x1xi32, #tpu.memory_space<vmem>>, vector<8x1xi32>
    %c128_i32 = arith.constant 128 : i32
    %7 = arith.muli %arg0, %c128_i32 : i32
    %8 = vector.broadcast %7 : i32 to vector<8x1xi32>
    %9 = arith.subi %6, %8 : vector<8x1xi32>
    %10 = tpu.iota {dimensions = array<i32: 1>} : vector<8x128xi32>
    %cst_4 = arith.constant 3.000000e+01 : f32
    %11 = vector.broadcast %cst_4 : f32 to vector<8x128xf32>
    %12 = arith.mulf %11, %5 : vector<8x128xf32>
    %13 = vector.broadcast %9 : vector<8x1xi32> to vector<8x128xi32>
    %14 = arith.cmpi eq, %10, %13 : vector<8x128xi32>
    %cst_5 = arith.constant 9.000000e+00 : f32
    %15 = vector.broadcast %cst_5 : f32 to vector<8x128xf32>
    %16 = arith.subf %12, %15 : vector<8x128xf32>
    %17 = arith.select %14, %16, %12 : vector<8x128xi1>, vector<8x128xf32>
    %c0_6 = arith.constant 0 : index
    %c0_7 = arith.constant 0 : index
    %18 = vector.load %arg5[%c0_6, %c0_7] : memref<8x128xf32, #tpu.memory_space<vmem>>, vector<8x128xf32>
    tpu.vector_store %arg5[%c0_6, %c0_7], %17 {strides = array<i32>} : memref<8x128xf32, #tpu.memory_space<vmem>>, vector<8x128xf32>,
    return
  }
  func.func @transform_0(%arg0: i32, %arg1: i32) -> (i32, i32) {
    %c0_i32 = arith.constant 0 : i32
    %c0_i32_0 = arith.constant 0 : i32
    %c0_i32_1 = arith.constant 0 : i32
    return %c0_i32, %c0_i32_0 : i32, i32
  }
  func.func @transform_1(%arg0: i32, %arg1: i32) -> (i32, i32) {
    %c0_i32 = arith.constant 0 : i32
    %c0_i32_0 = arith.constant 0 : i32
    return %c0_i32, %arg0 : i32, i32
  }
  func.func @transform_2(%arg0: i32, %arg1: i32) -> (i32, i32) {
    %c0_i32 = arith.constant 0 : i32
    %c0_i32_0 = arith.constant 0 : i32
    return %arg1, %c0_i32 : i32, i32
  }
  func.func @transform_3(%arg0: i32, %arg1: i32) -> (i32, i32) {
    %c0_i32 = arith.constant 0 : i32
    return %arg1, %arg0 : i32, i32
  }
}

</mosaic_0001>

<bundles_post_ra>
// kernel: tpu_custom_call.1
= control target key start
LH: loop header
LB: loop body
LE: loop exit
PB: predicated region body
PF: predicated region fallthrough
CT: control target
= control target key end

     0   :  { %v178_v3 = vmov 0.0|0.0   ;;  %vm179_vm0 = vmmov 0   ;;  %v180_v6 = vmov 0.0   ;;  %v181_v8 = vmov 0   ;;  %s233_s0 = inlined_call_operand.vmem [shape: f32[8,32], index: 0, kind: input, shape index: {}]   ;;  %s234_s1 = inlined_call_operand.vmem [shape: f32[32,16], index: 1, kind: input, shape index: {}]   ;;  %s235_s2 = inlined_call_operand.vmem [shape: s32[8,1], index: 2, kind: input, shape index: {}]   ;;  %s236_s3 = inlined_call_operand.hbm [shape: f32[8,16], index: 3, kind: output, shape index: {}]  }
   0x1   :  { %v18_v0 = vld [vmem:[%s234_s1] sm:$0xff]  ;;  %v19_v1 = vld [vmem:[%s234_s1 + $0x8] sm:$0xff]  ;;  %v20_v2 = vld [vmem:[%s234_s1 + $0x10] sm:$0xff]  ;;  %142 = vmatprep.subr.bf16.mxu0 %v178_v3  ;;  %139 = vmatprep.mubr.msk.f32.mxu0 %vm179_vm0, %v180_v6 }
   0x2   :  { %v143_v4 = vpack.c.bf16 %v19_v1, %v18_v0  ;;  %v21_v5 = vld [vmem:[%s234_s1 + $0x18] sm:$0xff]  ;;  %v96_v7 = vld [vmem:[%s235_s2] sm:$0xff]  ;;  %153 = vset.pattern.permute.xlu0 %v181_v8 }
   0x3   :  { %8 = vsyncpa [#allocation3], 0  ;;  %v146_v9 = vpack.c.bf16 %v21_v5, %v20_v2  ;;  %104 = vperm.xlu0 %153, %v96_v7   ;;  %v17_v10 = vld [vmem:[%s233_s0] sm:$0xff]  ;;  %vm22_vm1 = vcmask 261120   ;;  %v100_v11 = vlaneseq  ;;  %s182_s1 = smov [#allocation2]  }
   0x4   :  { %144 = vmatpush3.bf16.msra.mxu0 %v143_v4  ;;  %s116_s2 = sshll.u32 %s182_s1, 4  ;;  %s117_s2 = int_to_ptr.vmem [resolvable:$true] %s116_s2 }
   0x5   :  { %145 = vmatprep.subr.bf16.mxu0 %v178_v3  ;;  %v101_v12 = vand.u32 127, %v100_v11  ;;  %s154_s24 = scalar_lea.vmem %s117_s2, 128  ;;  %p159_p1 = scmp.lt.s32.totalorder %s117_s2, %s117_s2 }
   0x6   :  { %p155_p0 = scmp.ne.s32.totalorder %s117_s2, %s154_s24  ;;  %p160_p2 = scmp.lt.s32.totalorder %s154_s24, %s154_s24 }
   0x8   :  { %147 = vmatpush3.bf16.msra.mxu0 %v146_v9  ;;  %p161_p3 = por %p160_p2, %p159_p1 }
   0xa   :  { %p162_p4 = pnand %p161_p3, %p155_p0 }
   0xb   :  { %140 = vmatmul.mubr.msk.f32.vlgmr.msra.gmra.mrb[0].mxu0 %vm22_vm1, %v17_v10 }
  0x82   :  { %v105_v13 = vpop.permute.xlu0 %104 }
  0x83   :  { %vm106_vm2 = vcmp.eq.s32.totalorder %v101_v12, %v105_v13 }
  0xde   :  { %v92_v14 = vpop.f32.mrb[0].mxu0 }
  0xdf   :  { %v102_v15 = vmul.f32 30.0, %v92_v14  ;;  %v141_v16 = vpop.f32.mrb[1].mxu0 }
  0xe1   :  { %v125_v17 = vadd.f32 -9.0, %v102_v15 }
  0xe3   :  { %v108_v18 = vsel %vm106_vm2, %v125_v17, %v102_v15 }
  0xe4   :  { %109 = vst [vmem:[#allocation2] sm:$0xff] %v108_v18 }
  0xe5   :  { %165 = shalt.err (!%p162_p4)
}
  0xe6   :  { %s166_s26 = scalar_lea.hbm %s236_s3, 128 }
  0xe7   :  { %p167_p5 = scmp.ne.s32.totalorder %s236_s3, %s166_s26  ;;  %p170_p6 = scmp.lt.u32.totalorder %s166_s26, %s236_s3 }
  0xe9   :  { %p172_p7 = pnand %p170_p6, %p167_p5 }
  0xeb   :  { %175 = shalt.err (!%p172_p7)
}
  0xec   :  { %119 = dma.vmem_to_hbm [thread:$0]  %s117_s2, 128, %s236_s3, [#allocation3]  }
  0xed   :  { %176 = dma.done.wait [#allocation3], 128  }
  0xee   :  { %177 = vsyncadd [#allocation3], 4294967168 }
  0xef   :  { %123 = vsyncpa [#allocation3], 1 }

</bundles_post_ra>
